<compile_context>
chip_gen: v7x
topology: tpu7x:2x2x1
jax: 0.10.0
libtpu: 0.0.40
codegen_flags: <defaults>
</compile_context>

<pallas_src>
import jax
import jax.numpy as jnp
from jax.experimental import pallas as pl
from jax.experimental.pallas import tpu as pltpu

BN_EPS = 1e-5
LANE = 128


def gnn_kernel(a_ref, x_ref, w0_ref, w1_ref, w2_ref, wc1_ref, wc2_ref,
               bias_ref, out_ref):
    a = a_ref[...]            # (N, N)   bf16 normalized adjacency (+ self loops)
    h = x_ref[...]            # (N, 128) bf16 node features (zero-padded lanes)
    bias = bias_ref[...]      # (8, 128) f32 packed bias slab

    def fused_gcn(h_bf16, w_ref, row):
        # GCNConv with BatchNorm pre-folded: A_hat @ (h @ W') + b', then ReLU.
        hw = jnp.dot(h_bf16, w_ref[...], preferred_element_type=jnp.float32)
        agg = jnp.dot(a, hw.astype(jnp.bfloat16),
                      preferred_element_type=jnp.float32)
        out = jnp.maximum(agg + bias[row:row + 1, :], 0.0)   # bias + ReLU
        return out.astype(jnp.bfloat16)                      # Dropout: eval no-op

    h = fused_gcn(h, w0_ref, 0)
    h = fused_gcn(h, w1_ref, 1)
    h = fused_gcn(h, w2_ref, 2)

    # classifier: Linear(H -> H//2, zero-padded to 128 lanes) + ReLU
    z = jnp.dot(h, wc1_ref[...], preferred_element_type=jnp.float32) + bias[3:4, :]
    z = jnp.maximum(z, 0.0)
    # Linear(H//2 -> 1) as elementwise mul + lane reduction (avoid 1-wide MXU
    # matmul); broadcast into a lane-dense (N, 128) output slab.
    r = jnp.sum(z * wc2_ref[...], axis=-1, keepdims=True)    # (N, 1) f32
    out_ref[...] = r + bias[4:5, :]                          # + b2, lane-dense


def _pad_last(t, width):
    pad = width - t.shape[-1]
    if pad <= 0:
        return t
    return jnp.pad(t, [(0, 0)] * (t.ndim - 1) + [(0, pad)])


@jax.jit
def gnn_forward(a_hat, x, params):
    """Eval-mode forward. Assumes hidden_dim == 128 (the module default)."""
    n, f_in = x.shape

    # ---- fold BatchNorm into GCN weights/bias (f32, before any bf16 cast) ----
    fused_w, fused_b = [], []
    for layer in params["gcn"]:
        scale = layer["gamma"] * jax.lax.rsqrt(layer["var"] + BN_EPS)   # (1, H)
        fused_w.append(layer["w"] * scale)                               # scale cols
        fused_b.append((layer["b"] - layer["mean"]) * scale + layer["beta"])

    # ---- lane-dense packing / padding ----
    f_pad = ((f_in + LANE - 1) // LANE) * LANE
    x_p = jnp.pad(x, ((0, 0), (0, f_pad - f_in)))                       # (N, 128)
    w0 = jnp.pad(fused_w[0], ((0, f_pad - f_in), (0, 0)))               # (128, H)
    w1, w2 = fused_w[1], fused_w[2]

    wc1 = _pad_last(params["clf"]["w1"], LANE)                          # (H, 128)
    wc2_row = _pad_last(params["clf"]["w2"].T, LANE)                    # (1, 128) f32
    b_c1 = _pad_last(params["clf"]["b1"], LANE)                         # (1, 128)
    b_c2 = jnp.broadcast_to(params["clf"]["b2"], (1, LANE))             # (1, 128)

    # single packed bias slab: rows 0-2 fused GCN biases, 3 clf b1, 4 clf b2
    bias_slab = jnp.zeros((8, LANE), jnp.float32)
    bias_slab = bias_slab.at[0:1].set(_pad_last(fused_b[0], LANE))
    bias_slab = bias_slab.at[1:2].set(_pad_last(fused_b[1], LANE))
    bias_slab = bias_slab.at[2:3].set(_pad_last(fused_b[2], LANE))
    bias_slab = bias_slab.at[3:4].set(b_c1)
    bias_slab = bias_slab.at[4:5].set(b_c2)

    bf16 = jnp.bfloat16
    flat = [a_hat.astype(bf16), x_p.astype(bf16),
            w0.astype(bf16), w1.astype(bf16), w2.astype(bf16),
            wc1.astype(bf16), wc2_row.astype(jnp.float32), bias_slab]

    # TODO(synk): for large N the dense A_hat must be row-tiled with a grid
    # axis (parallel for v7x dual-TC) instead of fully VMEM-resident.
    vmem = pl.BlockSpec(memory_space=pltpu.MemorySpace.VMEM)
    out = pl.pallas_call(
        gnn_kernel,
        out_shape=jax.ShapeDtypeStruct((n, LANE), jnp.float32),
        in_specs=[vmem] * len(flat),
        out_specs=vmem,
    )(*flat)
    return out[:, :1]                                                   # (N, 1)


# ---------------- glue: graph construction & parameter init ----------------

def build_normalized_adjacency(edge_index, n):
    """Dense D^{-1/2}(A+I)D^{-1/2}, matching PyG GCNConv normalization.
    Note: duplicate edges are deduped (the original create_patient_similarity_graph
    already dedups via a set, so this matches)."""
    src, dst = edge_index
    A = jnp.zeros((n, n), jnp.float32)
    A = A.at[src, dst].set(1.0)
    A = A.at[dst, src].set(1.0)              # undirected similarity graph
    A = A + jnp.eye(n, dtype=jnp.float32)    # self loops
    deg = A.sum(axis=1)
    d_inv_sqrt = 1.0 / jnp.sqrt(deg)
    return A * d_inv_sqrt[:, None] * d_inv_sqrt[None, :]


def init_params(key, input_dim, hidden_dim, num_layers=3):
    keys = jax.random.split(key, 2 * num_layers + 4)
    gcn = []
    dims = [input_dim] + [hidden_dim] * num_layers
    for i in range(num_layers):
        kin, kout = dims[i], dims[i + 1]
        w = jax.random.normal(keys[2 * i], (kin, kout), jnp.float32) / jnp.sqrt(kin)
        b = 0.01 * jax.random.normal(keys[2 * i + 1], (1, kout), jnp.float32)
        # non-trivial deterministic BN running stats / affine params
        gamma = 1.0 + 0.1 * jnp.cos(jnp.arange(kout, dtype=jnp.float32))[None, :]
        beta = 0.05 * jnp.sin(jnp.arange(kout, dtype=jnp.float32))[None, :]
        mean = 0.1 * jnp.sin(0.5 * jnp.arange(kout, dtype=jnp.float32))[None, :]
        var = 1.0 + 0.2 * jnp.abs(jnp.cos(0.3 * jnp.arange(kout, dtype=jnp.float32)))[None, :]
        gcn.append(dict(w=w, b=b, gamma=gamma, beta=beta, mean=mean, var=var))

    h2 = hidden_dim // 2
    clf = dict(
        w1=jax.random.normal(keys[-4], (hidden_dim, h2), jnp.float32) / jnp.sqrt(hidden_dim),
        b1=0.01 * jax.random.normal(keys[-3], (1, h2), jnp.float32),
        w2=jax.random.normal(keys[-2], (h2, 1), jnp.float32) / jnp.sqrt(h2),
        b2=0.01 * jax.random.normal(keys[-1], (1, 1), jnp.float32),
    )
    return dict(gcn=gcn, clf=clf)


def reference_forward(a_hat, x, params):
    """Pure-JAX f32 eval-mode reference (unfused BN) for correctness check."""
    h = x
    for layer in params["gcn"]:
        h = a_hat @ (h @ layer["w"]) + layer["b"]
        scale = layer["gamma"] / jnp.sqrt(layer["var"] + BN_EPS)
        h = (h - layer["mean"]) * scale + layer["beta"]
        h = jnp.maximum(h, 0.0)
    z = jnp.maximum(h @ params["clf"]["w1"] + params["clf"]["b1"], 0.0)
    return z @ params["clf"]["w2"] + params["clf"]["b2"]


if __name__ == "__main__":
    N_NODES = 16        # "patients"
    INPUT_DIM = 64      # gene-expression features (zero-padded to 128 lanes)
    HIDDEN_DIM = 128    # module default hidden_dim (lane-dense)
    NUM_LAYERS = 3

    key = jax.random.PRNGKey(0)
    kx, kp = jax.random.split(key)

    # node features (patients x genes)
    x = jax.random.normal(kx, (N_NODES, INPUT_DIM), jnp.float32)

    # deterministic synthetic similarity graph: ring + skip-2 connections
    idx = jnp.arange(N_NODES)
    src = jnp.concatenate([idx, idx])
    dst = jnp.concatenate([(idx + 1) % N_NODES, (idx + 2) % N_NODES])
    edge_index = jnp.stack([src, dst])            # (2, E), COO like PyG

    a_hat = build_normalized_adjacency(edge_index, N_NODES)
    params = init_params(kp, INPUT_DIM, HIDDEN_DIM, NUM_LAYERS)

    out = gnn_forward(a_hat, x, params)
    jax.block_until_ready(out)
    assert out.shape == (N_NODES, 1) and out.dtype == jnp.float32

    ref = reference_forward(a_hat, x, params)
    assert bool(jnp.allclose(out, ref, rtol=0.1, atol=0.1)), "mismatch vs reference"

    # TODO(synk): training-mode Dropout / BatchNorm batch-statistics are not
    # implemented; this kernel reproduces eval-mode forward semantics.
    print("KERNEL_OK")
</pallas_src>

<mosaic_0001>
module attributes {stable_mosaic.version = 11 : i64} {
  func.func @gnn_kernel(%arg0: memref<16x16xbf16, #tpu.memory_space<vmem>>, %arg1: memref<16x128xbf16, #tpu.memory_space<vmem>>, %arg2: memref<128x128xbf16, #tpu.memory_space<vmem>>, %arg3: memref<128x128xbf16, #tpu.memory_space<vmem>>, %arg4: memref<128x128xbf16, #tpu.memory_space<vmem>>, %arg5: memref<128x128xbf16, #tpu.memory_space<vmem>>, %arg6: memref<1x128xf32, #tpu.memory_space<vmem>>, %arg7: memref<8x128xf32, #tpu.memory_space<vmem>>, %arg8: memref<16x128xf32, #tpu.memory_space<vmem>>) attributes {dimension_semantics = [], scalar_prefetch = 0 : i64, scratch_operands = 0 : i64, tpu.core_type = #tpu.core_type<tc>} {
    %c0 = arith.constant 0 : index
    %c0_0 = arith.constant 0 : index
    %0 = vector.load %arg0[%c0, %c0_0] : memref<16x16xbf16, #tpu.memory_space<vmem>>, vector<16x16xbf16>
    %c0_1 = arith.constant 0 : index
    %c0_2 = arith.constant 0 : index
    %1 = vector.load %arg1[%c0_1, %c0_2] : memref<16x128xbf16, #tpu.memory_space<vmem>>, vector<16x128xbf16>
    %c0_3 = arith.constant 0 : index
    %c0_4 = arith.constant 0 : index
    %2 = vector.load %arg7[%c0_3, %c0_4] : memref<8x128xf32, #tpu.memory_space<vmem>>, vector<8x128xf32>
    %c0_5 = arith.constant 0 : index
    %c0_6 = arith.constant 0 : index
    %3 = vector.load %arg2[%c0_5, %c0_6] : memref<128x128xbf16, #tpu.memory_space<vmem>>, vector<128x128xbf16>
    %cst = arith.constant dense<0.000000e+00> : vector<16x128xf32>
    %4 = tpu.matmul %1, %3, %cst {dimension_numbers = #tpu.dot_dimension_numbers<[1], [0], [0], [1], [0, 0, 1, 1], [], []>} : vector<16x128xbf16>, vector<128x128xbf16>, vector<16x128xf32> -> vector<16x128xf32>
    %5 = arith.truncf %4 : vector<16x128xf32> to vector<16x128xbf16>
    %cst_7 = arith.constant dense<0.000000e+00> : vector<16x128xf32>
    %6 = tpu.matmul %0, %5, %cst_7 {dimension_numbers = #tpu.dot_dimension_numbers<[1], [0], [0], [1], [0, 0, 1, 1], [], []>} : vector<16x16xbf16>, vector<16x128xbf16>, vector<16x128xf32> -> vector<16x128xf32>
    %7 = vector.extract_strided_slice %2 {offsets = [0, 0], sizes = [1, 128], strides = [1, 1]} : vector<8x128xf32> to vector<1x128xf32>
    %8 = vector.broadcast %7 : vector<1x128xf32> to vector<16x128xf32>
    %9 = arith.addf %6, %8 : vector<16x128xf32>
    %cst_8 = arith.constant 0.000000e+00 : f32
    %10 = vector.broadcast %cst_8 : f32 to vector<16x128xf32>
    %11 = arith.maximumf %9, %10 : vector<16x128xf32>
    %12 = arith.truncf %11 : vector<16x128xf32> to vector<16x128xbf16>
    %c0_9 = arith.constant 0 : index
    %c0_10 = arith.constant 0 : index
    %13 = vector.load %arg3[%c0_9, %c0_10] : memref<128x128xbf16, #tpu.memory_space<vmem>>, vector<128x128xbf16>
    %cst_11 = arith.constant dense<0.000000e+00> : vector<16x128xf32>
    %14 = tpu.matmul %12, %13, %cst_11 {dimension_numbers = #tpu.dot_dimension_numbers<[1], [0], [0], [1], [0, 0, 1, 1], [], []>} : vector<16x128xbf16>, vector<128x128xbf16>, vector<16x128xf32> -> vector<16x128xf32>
    %15 = arith.truncf %14 : vector<16x128xf32> to vector<16x128xbf16>
    %cst_12 = arith.constant dense<0.000000e+00> : vector<16x128xf32>
    %16 = tpu.matmul %0, %15, %cst_12 {dimension_numbers = #tpu.dot_dimension_numbers<[1], [0], [0], [1], [0, 0, 1, 1], [], []>} : vector<16x16xbf16>, vector<16x128xbf16>, vector<16x128xf32> -> vector<16x128xf32>
    %17 = vector.extract_strided_slice %2 {offsets = [1, 0], sizes = [1, 128], strides = [1, 1]} : vector<8x128xf32> to vector<1x128xf32>
    %18 = vector.broadcast %17 : vector<1x128xf32> to vector<16x128xf32>
    %19 = arith.addf %16, %18 : vector<16x128xf32>
    %cst_13 = arith.constant 0.000000e+00 : f32
    %20 = vector.broadcast %cst_13 : f32 to vector<16x128xf32>
    %21 = arith.maximumf %19, %20 : vector<16x128xf32>
    %22 = arith.truncf %21 : vector<16x128xf32> to vector<16x128xbf16>
    %c0_14 = arith.constant 0 : index
    %c0_15 = arith.constant 0 : index
    %23 = vector.load %arg4[%c0_14, %c0_15] : memref<128x128xbf16, #tpu.memory_space<vmem>>, vector<128x128xbf16>
    %cst_16 = arith.constant dense<0.000000e+00> : vector<16x128xf32>
    %24 = tpu.matmul %22, %23, %cst_16 {dimension_numbers = #tpu.dot_dimension_numbers<[1], [0], [0], [1], [0, 0, 1, 1], [], []>} : vector<16x128xbf16>, vector<128x128xbf16>, vector<16x128xf32> -> vector<16x128xf32>
    %25 = arith.truncf %24 : vector<16x128xf32> to vector<16x128xbf16>
    %cst_17 = arith.constant dense<0.000000e+00> : vector<16x128xf32>
    %26 = tpu.matmul %0, %25, %cst_17 {dimension_numbers = #tpu.dot_dimension_numbers<[1], [0], [0], [1], [0, 0, 1, 1], [], []>} : vector<16x16xbf16>, vector<16x128xbf16>, vector<16x128xf32> -> vector<16x128xf32>
    %27 = vector.extract_strided_slice %2 {offsets = [2, 0], sizes = [1, 128], strides = [1, 1]} : vector<8x128xf32> to vector<1x128xf32>
    %28 = vector.broadcast %27 : vector<1x128xf32> to vector<16x128xf32>
    %29 = arith.addf %26, %28 : vector<16x128xf32>
    %cst_18 = arith.constant 0.000000e+00 : f32
    %30 = vector.broadcast %cst_18 : f32 to vector<16x128xf32>
    %31 = arith.maximumf %29, %30 : vector<16x128xf32>
    %32 = arith.truncf %31 : vector<16x128xf32> to vector<16x128xbf16>
    %c0_19 = arith.constant 0 : index
    %c0_20 = arith.constant 0 : index
    %33 = vector.load %arg5[%c0_19, %c0_20] : memref<128x128xbf16, #tpu.memory_space<vmem>>, vector<128x128xbf16>
    %cst_21 = arith.constant dense<0.000000e+00> : vector<16x128xf32>
    %34 = tpu.matmul %32, %33, %cst_21 {dimension_numbers = #tpu.dot_dimension_numbers<[1], [0], [0], [1], [0, 0, 1, 1], [], []>} : vector<16x128xbf16>, vector<128x128xbf16>, vector<16x128xf32> -> vector<16x128xf32>
    %35 = vector.extract_strided_slice %2 {offsets = [3, 0], sizes = [1, 128], strides = [1, 1]} : vector<8x128xf32> to vector<1x128xf32>
    %36 = vector.broadcast %35 : vector<1x128xf32> to vector<16x128xf32>
    %37 = arith.addf %34, %36 : vector<16x128xf32>
    %cst_22 = arith.constant 0.000000e+00 : f32
    %38 = vector.broadcast %cst_22 : f32 to vector<16x128xf32>
    %39 = arith.maximumf %37, %38 : vector<16x128xf32>
    %c0_23 = arith.constant 0 : index
    %c0_24 = arith.constant 0 : index
    %40 = vector.load %arg6[%c0_23, %c0_24] : memref<1x128xf32, #tpu.memory_space<vmem>>, vector<1x128xf32>
    %41 = vector.broadcast %40 : vector<1x128xf32> to vector<16x128xf32>
    %42 = arith.mulf %39, %41 : vector<16x128xf32>
    %cst_25 = arith.constant dense<0.000000e+00> : vector<16xf32>
    %43 = vector.multi_reduction <add>, %42, %cst_25 [1] : vector<16x128xf32> to vector<16xf32>
    %44 = vector.shape_cast %43 : vector<16xf32> to vector<16x1xf32>
    %45 = vector.extract_strided_slice %2 {offsets = [4, 0], sizes = [1, 128], strides = [1, 1]} : vector<8x128xf32> to vector<1x128xf32>
    %46 = vector.broadcast %44 : vector<16x1xf32> to vector<16x128xf32>
    %47 = vector.broadcast %45 : vector<1x128xf32> to vector<16x128xf32>
    %48 = arith.addf %46, %47 : vector<16x128xf32>
    %c0_26 = arith.constant 0 : index
    %c0_27 = arith.constant 0 : index
    %49 = vector.load %arg8[%c0_26, %c0_27] : memref<16x128xf32, #tpu.memory_space<vmem>>, vector<16x128xf32>
    tpu.vector_store %arg8[%c0_26, %c0_27], %48 {strides = array<i32>} : memref<16x128xf32, #tpu.memory_space<vmem>>, vector<16x128xf32>,
    return
  }
}

</mosaic_0001>

<bundles_post_ra>
// kernel: gnn_forward.1
= control target key start
LH: loop header
LB: loop body
LE: loop exit
PB: predicated region body
PF: predicated region fallthrough
CT: control target
= control target key end

     0   :  { %v862_v0 = vmov 0.0   ;;  %vm863_vm0 = vmmov 0   ;;  %vm156_vm1 = vcmask 130048   ;;  %v147_v24 = vlaneseq  ;;  %s1094_s2 = inlined_call_operand.vmem [shape: bf16[128,128], index: 2, kind: input, shape index: {}]   ;;  %s1095_s1 = inlined_call_operand.vmem [shape: bf16[16,128], index: 1, kind: input, shape index: {}]   ;;  %s1096_s0 = inlined_call_operand.vmem [shape: bf16[16,16], index: 0, kind: input, shape index: {}]   ;;  %s1097_s3 = inlined_call_operand.vmem [shape: bf16[128,128], index: 3, kind: input, shape index: {}]   ;;  %s1098_s7 = inlined_call_operand.vmem [shape: f32[8,128], index: 7, kind: input, shape index: {}]   ;;  %s1099_s4 = inlined_call_operand.vmem [shape: bf16[128,128], index: 4, kind: input, shape index: {}]   ;;  %s1100_s5 = inlined_call_operand.vmem [shape: bf16[128,128], index: 5, kind: input, shape index: {}]   ;;  %s1101_s6 = inlined_call_operand.vmem [shape: f32[1,128], index: 6, kind: input, shape index: {}]   ;;  %s1102_s8 = inlined_call_operand.vmem [shape: f32[16,128], index: 8, kind: output, shape index: {}]  }
   0x1   :  { %728 = vmatprep.subr.bf16.mxu0 %v862_v0  ;;  %v828_v1 = vld [vmem:[%s1094_s2] sm:$0xff]   ;;  %744 = vmatprep.mubr.msk.bf16.mxu0 %vm863_vm0, %v862_v0  ;;  %v829_v2 = vld [vmem:[%s1094_s2 + $0x8] sm:$0xff]   ;;  %v830_v3 = vld [vmem:[%s1094_s2 + $0x10] sm:$0xff]  }
   0x2   :  { %748 = vmatprep.subr.bf16.mxu1 %v862_v0  ;;  %750 = vmatprep.mubr.msk.bf16.mxu1 %vm863_vm0, %v862_v0  ;;  %v831_v4 = vld [vmem:[%s1094_s2 + $0x18] sm:$0xff]   ;;  %v832_v5 = vld [vmem:[%s1094_s2 + $0x20] sm:$0xff]   ;;  %v833_v6 = vld [vmem:[%s1094_s2 + $0x28] sm:$0xff]   ;;  %v994_v25 = vshrl.u32 %v147_v24, 7 }
   0x3   :  { %729 = vmatpush3.bf16.msra.mxu0 %v828_v1  ;;  %v834_v7 = vld [vmem:[%s1094_s2 + $0x30] sm:$0xff]   ;;  %v835_v8 = vld [vmem:[%s1094_s2 + $0x38] sm:$0xff]   ;;  %v836_v9 = vld [vmem:[%s1095_s1] sm:$0xff]  }
   0x4   :  { %730 = vmatprep.subr.bf16.mxu0 %v862_v0  ;;  %v955_v15 = vld [vmem:[%s1096_s0] sm:$0xff]   ;;  %v839_v17 = vld [vmem:[%s1097_s3 + $0x8] sm:$0xff]   ;;  %v840_v18 = vld [vmem:[%s1097_s3 + $0x10] sm:$0xff]   ;;  %v149_v26 = vsub.s32 0, %v994_v25  ;;  %v312_v51 = vsub.s32 1, %v994_v25 }
   0x5   :  { %v838_v16 = vld [vmem:[%s1097_s3] sm:$0xff]   ;;  %v841_v19 = vld [vmem:[%s1097_s3 + $0x18] sm:$0xff]   ;;  %v843_v21 = vld [vmem:[%s1097_s3 + $0x28] sm:$0xff]  }
   0x6   :  { %v842_v20 = vld [vmem:[%s1097_s3 + $0x20] sm:$0xff]   ;;  %v844_v22 = vld [vmem:[%s1097_s3 + $0x30] sm:$0xff]   ;;  %v845_v23 = vld [vmem:[%s1097_s3 + $0x38] sm:$0xff]  }
   0x7   :  { %731 = vmatpush3.bf16.msra.mxu0 %v829_v2  ;;  %v1000_v27 = vld [vmem:[%s1098_s7] sm:$0xff]  ;;  %v847_v44 = vld [vmem:[%s1099_s4 + $0x8] sm:$0xff]   ;;  %v848_v45 = vld [vmem:[%s1099_s4 + $0x10] sm:$0xff]  }
   0x8   :  { %732 = vmatprep.subr.bf16.mxu0 %v862_v0  ;;  %v150_v28 = vrot.slane %v1000_v27, %v149_v26  ;;  %v846_v43 = vld [vmem:[%s1099_s4] sm:$0xff]   ;;  %v849_v46 = vld [vmem:[%s1099_s4 + $0x18] sm:$0xff]   ;;  %v851_v48 = vld [vmem:[%s1099_s4 + $0x28] sm:$0xff]   ;;  %v313_v52 = vrot.slane %v1000_v27, %v312_v51 }
   0x9   :  { %v850_v47 = vld [vmem:[%s1099_s4 + $0x20] sm:$0xff]   ;;  %v852_v49 = vld [vmem:[%s1099_s4 + $0x30] sm:$0xff]   ;;  %v853_v50 = vld [vmem:[%s1099_s4 + $0x38] sm:$0xff]  }
   0xb   :  { %733 = vmatpush3.bf16.msra.mxu0 %v830_v3 }
   0xc   :  { %734 = vmatprep.subr.bf16.mxu0 %v862_v0 }
   0xf   :  { %735 = vmatpush3.bf16.msra.mxu0 %v831_v4  ;;  %v854_v4 = vld [vmem:[%s1100_s5] sm:$0xff]  }
  0x10   :  { %736 = vmatprep.subr.bf16.mxu0 %v862_v0 }
  0x13   :  { %737 = vmatpush3.bf16.msra.mxu0 %v832_v5  ;;  %v855_v5 = vld [vmem:[%s1100_s5 + $0x8] sm:$0xff]  }
  0x14   :  { %738 = vmatprep.subr.bf16.mxu0 %v862_v0 }
  0x17   :  { %739 = vmatpush3.bf16.msra.mxu0 %v833_v6  ;;  %v856_v6 = vld [vmem:[%s1100_s5 + $0x10] sm:$0xff]  }
  0x18   :  { %740 = vmatprep.subr.bf16.mxu0 %v862_v0 }
  0x1b   :  { %741 = vmatpush3.bf16.msra.mxu0 %v834_v7  ;;  %v857_v7 = vld [vmem:[%s1100_s5 + $0x18] sm:$0xff]  }
  0x1c   :  { %742 = vmatprep.subr.bf16.mxu0 %v862_v0 }
  0x1f   :  { %743 = vmatpush3.bf16.msra.mxu0 %v835_v8  ;;  %v858_v8 = vld [vmem:[%s1100_s5 + $0x20] sm:$0xff]  }
  0x20   :  { %800 = vmatprep.subr.bf16.mxu0 %v862_v0 }
  0x22   :  { %745 = vmatmul.mubr.bf16.vlgmr.msra.gmra.mrb[0].mxu0 %v836_v9  ;;  %v859_v9 = vld [vmem:[%s1100_s5 + $0x28] sm:$0xff]  }
  0x23   :  { %802 = vmatprep.mubr.msk.bf16.mxu0 %vm863_vm0, %v862_v0 }
  0xf5   :  { %v139_v10 = vpop.f32.mrb[0].mxu0 }
  0xf6   :  { %v746_v11 = vpop.f32.mrb[1].mxu0 }
  0xf7   :  { %v142_v12 = vpop.f32.mrb[2].mxu0  ;;  %v861_v11 = vld [vmem:[%s1100_s5 + $0x38] sm:$0xff]  }
  0xf8   :  { %v146_v13 = vpack.c.bf16 %v142_v12, %v139_v10  ;;  %v747_v14 = vpop.f32.mrb[3].mxu0  ;;  %v860_v10 = vld [vmem:[%s1100_s5 + $0x30] sm:$0xff]   ;;  %v466_v12 = vsub.s32 2, %v994_v25 }
  0xfa   :  { %749 = vmatpush3.bf16.msra.mxu1 %v146_v13  ;;  %v467_v13 = vrot.slane %v1000_v27, %v466_v12 }
  0xfb   :  { %754 = vmatprep.subr.bf16.mxu1 %v862_v0 }
  0xfd   :  { %751 = vmatmul.mubr.msk.bf16.vlgmr.msra.gmra.mrb[0].mxu1 %vm156_vm1, %v955_v15 }
  0xfe   :  { %755 = vmatpush3.bf16.msra.mxu1 %v838_v16  ;;  %770 = vmatprep.mubr.msk.bf16.mxu1 %vm863_vm0, %v862_v0 }
  0xff   :  { %756 = vmatprep.subr.bf16.mxu1 %v862_v0 }
 0x102   :  { %757 = vmatpush3.bf16.msra.mxu1 %v839_v17 }
 0x103   :  { %758 = vmatprep.subr.bf16.mxu1 %v862_v0 }
 0x106   :  { %759 = vmatpush3.bf16.msra.mxu1 %v840_v18 }
 0x107   :  { %760 = vmatprep.subr.bf16.mxu1 %v862_v0 }
 0x10a   :  { %761 = vmatpush3.bf16.msra.mxu1 %v841_v19 }
 0x10b   :  { %762 = vmatprep.subr.bf16.mxu1 %v862_v0 }
 0x10e   :  { %763 = vmatpush3.bf16.msra.mxu1 %v842_v20 }
 0x10f   :  { %764 = vmatprep.subr.bf16.mxu1 %v862_v0 }
 0x112   :  { %765 = vmatpush3.bf16.msra.mxu1 %v843_v21 }
 0x113   :  { %766 = vmatprep.subr.bf16.mxu1 %v862_v0 }
 0x116   :  { %767 = vmatpush3.bf16.msra.mxu1 %v844_v22 }
 0x117   :  { %768 = vmatprep.subr.bf16.mxu1 %v862_v0 }
 0x11a   :  { %769 = vmatpush3.bf16.msra.mxu1 %v845_v23 }
 0x11b   :  { %774 = vmatprep.subr.bf16.mxu1 %v862_v0 }
 0x1d0   :  { %v194_v29 = vpop.f32.mrb[0].mxu1 }
 0x1d1   :  { %v195_v30 = vadd.f32 %v194_v29, %v150_v28  ;;  %v752_v31 = vpop.f32.mrb[1].mxu1 }
 0x1d2   :  { %v197_v32 = vpop.f32.mrb[2].mxu1 }
 0x1d3   :  { %v198_v33 = vadd.f32 %v197_v32, %v150_v28  ;;  %v753_v34 = vpop.f32.mrb[3].mxu1  ;;  %v201_v35 = vmax.f32 %v195_v30, 0.0  ;;  %v685_v30 = vld [vmem:[%s1101_s6] ss:$0 sm:$0xff] }
 0x1d5   :  { %v202_v36 = vmax.f32 %v198_v33, 0.0 }
 0x1d7   :  { %v203_v37 = vpack.c.bf16 %v202_v36, %v201_v35 }
 0x1d9   :  { %771 = vmatmul.mubr.bf16.vlgmr.msra.gmra.mrb[4].mxu1 %v203_v37  ;;  %v638_v37 = vsub.s32 4, %v994_v25 }
 0x1da   :  { %776 = vmatprep.mubr.msk.bf16.mxu1 %vm863_vm0, %v862_v0 }
 0x2ac   :  { %v302_v38 = vpop.f32.mrb[4].mxu1 }
 0x2ad   :  { %v772_v39 = vpop.f32.mrb[5].mxu1 }
 0x2ae   :  { %v305_v40 = vpop.f32.mrb[6].mxu1 }
 0x2af   :  { %v309_v41 = vpack.c.bf16 %v305_v40, %v302_v38  ;;  %v773_v42 = vpop.f32.mrb[7].mxu1  ;;  %v639_v38 = vrot.slane %v1000_v27, %v638_v37 }
 0x2b1   :  { %775 = vmatpush3.bf16.msra.mxu1 %v309_v41 }
 0x2b2   :  { %780 = vmatprep.subr.bf16.mxu1 %v862_v0 }
 0x2b4   :  { %777 = vmatmul.mubr.msk.bf16.vlgmr.msra.gmra.mrb[8].mxu1 %vm156_vm1, %v955_v15 }
 0x2b5   :  { %781 = vmatpush3.bf16.msra.mxu1 %v846_v43  ;;  %796 = vmatprep.mubr.msk.bf16.mxu1 %vm863_vm0, %v862_v0 }
 0x2b6   :  { %782 = vmatprep.subr.bf16.mxu1 %v862_v0 }
 0x2b9   :  { %783 = vmatpush3.bf16.msra.mxu1 %v847_v44 }
 0x2ba   :  { %784 = vmatprep.subr.bf16.mxu1 %v862_v0 }
 0x2bd   :  { %785 = vmatpush3.bf16.msra.mxu1 %v848_v45 }
 0x2be   :  { %786 = vmatprep.subr.bf16.mxu1 %v862_v0 }
 0x2c1   :  { %787 = vmatpush3.bf16.msra.mxu1 %v849_v46 }
 0x2c2   :  { %788 = vmatprep.subr.bf16.mxu1 %v862_v0 }
 0x2c5   :  { %789 = vmatpush3.bf16.msra.mxu1 %v850_v47 }
 0x2c6   :  { %790 = vmatprep.subr.bf16.mxu1 %v862_v0 }
 0x2c9   :  { %791 = vmatpush3.bf16.msra.mxu1 %v851_v48 }
 0x2ca   :  { %792 = vmatprep.subr.bf16.mxu1 %v862_v0 }
 0x2cd   :  { %793 = vmatpush3.bf16.msra.mxu1 %v852_v49 }
 0x2ce   :  { %794 = vmatprep.subr.bf16.mxu1 %v862_v0 }
 0x2d1   :  { %795 = vmatpush3.bf16.msra.mxu1 %v853_v50 }
 0x387   :  { %v348_v53 = vpop.f32.mrb[8].mxu1 }
 0x388   :  { %v349_v54 = vadd.f32 %v348_v53, %v313_v52  ;;  %v778_v55 = vpop.f32.mrb[9].mxu1 }
 0x389   :  { %v351_v56 = vpop.f32.mrb[10].mxu1 }
 0x38a   :  { %v352_v57 = vadd.f32 %v351_v56, %v313_v52  ;;  %v779_v58 = vpop.f32.mrb[11].mxu1  ;;  %v355_v59 = vmax.f32 %v349_v54, 0.0 }
 0x38c   :  { %v356_v60 = vmax.f32 %v352_v57, 0.0 }
 0x38e   :  { %v357_v61 = vpack.c.bf16 %v356_v60, %v355_v59 }
 0x390   :  { %797 = vmatmul.mubr.bf16.vlgmr.msra.gmra.mrb[12].mxu1 %v357_v61 }
 0x463   :  { %v456_v62 = vpop.f32.mrb[12].mxu1 }
 0x464   :  { %v798_v63 = vpop.f32.mrb[13].mxu1 }
 0x465   :  { %v459_v1 = vpop.f32.mrb[14].mxu1 }
 0x466   :  { %v463_v2 = vpack.c.bf16 %v459_v1, %v456_v62  ;;  %v799_v3 = vpop.f32.mrb[15].mxu1 }
 0x468   :  { %801 = vmatpush3.bf16.msra.mxu0 %v463_v2 }
 0x469   :  { %806 = vmatprep.subr.bf16.mxu0 %v862_v0 }
 0x46b   :  { %803 = vmatmul.mubr.msk.bf16.vlgmr.msra.gmra.mrb[4].mxu0 %vm156_vm1, %v955_v15 }
 0x46c   :  { %807 = vmatpush3.bf16.msra.mxu0 %v854_v4  ;;  %822 = vmatprep.mubr.msk.bf16.mxu0 %vm863_vm0, %v862_v0 }
 0x46d   :  { %808 = vmatprep.subr.bf16.mxu0 %v862_v0 }
 0x470   :  { %809 = vmatpush3.bf16.msra.mxu0 %v855_v5 }
 0x471   :  { %810 = vmatprep.subr.bf16.mxu0 %v862_v0 }
 0x474   :  { %811 = vmatpush3.bf16.msra.mxu0 %v856_v6 }
 0x475   :  { %812 = vmatprep.subr.bf16.mxu0 %v862_v0 }
 0x478   :  { %813 = vmatpush3.bf16.msra.mxu0 %v857_v7 }
 0x479   :  { %814 = vmatprep.subr.bf16.mxu0 %v862_v0 }
 0x47c   :  { %815 = vmatpush3.bf16.msra.mxu0 %v858_v8 }
 0x47d   :  { %816 = vmatprep.subr.bf16.mxu0 %v862_v0 }
 0x480   :  { %817 = vmatpush3.bf16.msra.mxu0 %v859_v9 }
 0x481   :  { %818 = vmatprep.subr.bf16.mxu0 %v862_v0 }
 0x484   :  { %819 = vmatpush3.bf16.msra.mxu0 %v860_v10 }
 0x485   :  { %820 = vmatprep.subr.bf16.mxu0 %v862_v0  ;;  %v530_v0 = vsub.s32 3, %v994_v25 }
 0x487   :  { %v531_v23 = vrot.slane %v1000_v27, %v530_v0 }
 0x488   :  { %821 = vmatpush3.bf16.msra.mxu0 %v861_v11 }
 0x53e   :  { %v502_v14 = vpop.f32.mrb[4].mxu0 }
 0x53f   :  { %v503_v15 = vadd.f32 %v502_v14, %v467_v13  ;;  %v804_v16 = vpop.f32.mrb[5].mxu0 }
 0x540   :  { %v505_v17 = vpop.f32.mrb[6].mxu0 }
 0x541   :  { %v506_v18 = vadd.f32 %v505_v17, %v467_v13  ;;  %v805_v19 = vpop.f32.mrb[7].mxu0  ;;  %v509_v20 = vmax.f32 %v503_v15, 0.0 }
 0x543   :  { %v510_v21 = vmax.f32 %v506_v18, 0.0 }
 0x545   :  { %v511_v22 = vpack.c.bf16 %v510_v21, %v509_v20 }
 0x547   :  { %823 = vmatmul.mubr.bf16.vlgmr.msra.gmra.mrb[8].mxu0 %v511_v22 }
 0x61a   :  { %v614_v24 = vpop.f32.mrb[8].mxu0 }
 0x61b   :  { %v615_v26 = vadd.f32 %v614_v24, %v531_v23  ;;  %v824_v28 = vpop.f32.mrb[9].mxu0 }
 0x61c   :  { %v617_v29 = vpop.f32.mrb[10].mxu0 }
 0x61d   :  { %v621_v31 = vmax.f32 %v615_v26, 0.0  ;;  %v618_v32 = vadd.f32 %v617_v29, %v531_v23  ;;  %v825_v33 = vpop.f32.mrb[11].mxu0 }
 0x61f   :  { %v622_v34 = vmax.f32 %v618_v32, 0.0  ;;  %v630_v35 = vmul.f32 %v685_v30, %v621_v31 }
 0x621   :  { %632 = vadd.xlane.f32.xlu0 %v630_v35  ;;  %v631_v36 = vmul.f32 %v685_v30, %v622_v34 }
 0x625   :  { %634 = vadd.xlane.f32.xlu0 %v631_v36 }
 0x6ae   :  { %v633_v39 = vpop.xlane.xlu0 %632 }
 0x6af   :  { %v640_v40 = vadd.f32 %v639_v38, %v633_v39 }
 0x6b1   :  { %642 = vst [vmem:[%s1102_s8] sm:$0xff] %v640_v40 }
 0x6b2   :  { %v635_v41 = vpop.xlane.xlu0 %634 }
 0x6b3   :  { %v641_v42 = vadd.f32 %v639_v38, %v635_v41 }
 0x6b5   :  { %643 = vst [vmem:[%s1102_s8 + $0x8] sm:$0xff] %v641_v42 }

</bundles_post_ra>
